<compile_context>
chip_gen: v5e
topology: v5e:2x2
jax: 0.10.0
libtpu: 0.0.40
codegen_flags: <defaults>
</compile_context>

<pallas_src>
import functools

import jax
import jax.numpy as jnp
from jax.experimental import pallas as pl
from jax.experimental.pallas import tpu as pltpu


def _vmem_budget_bytes():
    """Generation-aware scoped-VMEM budget (~80% of physical capacity)."""
    try:
        cap = getattr(pltpu.get_tpu_info(), "vmem_capacity_bytes", None)
        if cap:
            return max(int(cap * 4 // 5), 16 << 20)
    except Exception:
        pass
    return 48 << 20  # conservative default; fits v7x's 64 MiB physical VMEM


# ---------------------------------------------------------------------------
# Path A: fused single pass (1R + 1W of x), grid over B, whole (C, L) block.
# ---------------------------------------------------------------------------
def _se_fused_kernel(x_ref, w1t_ref, w2_ref, o_ref, *, l_true):
    # x_ref:   (1, C, L)  native dtype
    # w1t_ref: (C, Cr) f32 = W1.T (resident);  w2_ref: (C, Cr) f32 = W2 (resident)
    # Squeeze: per-channel mean over L, accumulated in f32.  Read x_ref directly
    # so the full tile is not held live across the gate computation.
    m = jnp.sum(x_ref[0], axis=-1, keepdims=True,
                dtype=jnp.float32) * (1.0 / l_true)                      # (C, 1)

    # Excitation: two tiny no-bias FCs on the VPU/XLU (broadcast-mul + reduce);
    # N=1 MXU matmuls would only add push/drain latency.
    h = jnp.maximum(jnp.sum(w1t_ref[...] * m, axis=0, keepdims=True), 0.0)   # (1, Cr)
    y = jax.nn.sigmoid(jnp.sum(w2_ref[...] * h, axis=-1, keepdims=True))     # (C, 1)

    # Scale: re-read the resident input block; multiply/store in native dtype
    # (only the (C, 1) gate is cast, never the full tile).
    o_ref[0] = (x_ref[0] * y.astype(o_ref.dtype)).astype(o_ref.dtype)


def _se_fused(x, w1t_f32, w2_f32, *, vmem_limit):
    b, c, l = x.shape
    cr = w1t_f32.shape[1]
    itemsize = jnp.dtype(x.dtype).itemsize
    cost = pl.CostEstimate(
        flops=int(2 * b * c * l + 4 * b * c * cr),
        transcendentals=int(b * c),
        bytes_accessed=int(2 * b * c * l * itemsize + 2 * c * cr * 4),
    )
    return pl.pallas_call(
        functools.partial(_se_fused_kernel, l_true=l),
        out_shape=jax.ShapeDtypeStruct((b, c, l), x.dtype),
        grid_spec=pltpu.PrefetchScalarGridSpec(
            num_scalar_prefetch=0,
            grid=(b,),
            in_specs=[
                pl.BlockSpec((1, c, l), lambda i: (i, 0, 0)),
                pl.BlockSpec((c, cr), lambda i: (0, 0)),   # W1.T, resident
                pl.BlockSpec((c, cr), lambda i: (0, 0)),   # W2,   resident
            ],
            out_specs=pl.BlockSpec((1, c, l), lambda i: (i, 0, 0)),
        ),
        compiler_params=pltpu.CompilerParams(
            dimension_semantics=("parallel",),
            vmem_limit_bytes=vmem_limit,
        ),
        input_output_aliases={0: 0},
        cost_estimate=cost,
    )(x, w1t_f32, w2_f32)


# ---------------------------------------------------------------------------
# Path B: two-pass fallback (2R + 1W).  Squeeze + excitation on the XLA side
# (tiny (B, C) gate), then a tiled Pallas scale kernel over grid (B, nL).
# ---------------------------------------------------------------------------
def _se_scale_kernel(x_ref, y_ref, o_ref):
    # x_ref: (1, C, tile_L) native dtype;  y_ref: (1, C, 1) f32 gate.
    o_ref[0] = (x_ref[0] * y_ref[0].astype(o_ref.dtype)).astype(o_ref.dtype)


def _se_two_pass(x, w1, w2, *, budget, tile_l=2048):
    b, c, l = x.shape
    # Pass 1: per-(b, channel) mean (f32 accumulation) + gate, on the XLA side.
    m = jnp.mean(x, axis=-1, dtype=jnp.float32)                  # (B, C)
    h = jnp.maximum(m @ w1.T.astype(jnp.float32), 0.0)           # (B, C//r)
    y = jax.nn.sigmoid(h @ w2.T.astype(jnp.float32))             # (B, C)
    y3 = y.reshape(b, c, 1)

    # Lane-dense tiles: a 128-multiple tile when L is large (boundary tile is
    # masked by Pallas), or the full L extent when L already fits one tile.
    tl = l if l <= tile_l else tile_l
    nl = pl.cdiv(l, tl)

    itemsize = jnp.dtype(x.dtype).itemsize
    block_bytes = c * tl * itemsize
    vmem_limit = int(min(max(4 * block_bytes + (2 << 20), 16 << 20), budget))
    cost = pl.CostEstimate(
        flops=int(b * c * l),
        transcendentals=0,
        bytes_accessed=int(2 * b * c * l * itemsize),
    )
    return pl.pallas_call(
        _se_scale_kernel,
        out_shape=jax.ShapeDtypeStruct((b, c, l), x.dtype),
        grid_spec=pltpu.PrefetchScalarGridSpec(
            num_scalar_prefetch=0,
            grid=(b, nl),
            in_specs=[
                pl.BlockSpec((1, c, tl), lambda i, j: (i, 0, j)),
                pl.BlockSpec((1, c, 1), lambda i, j: (i, 0, 0)),
            ],
            out_specs=pl.BlockSpec((1, c, tl), lambda i, j: (i, 0, j)),
        ),
        compiler_params=pltpu.CompilerParams(
            dimension_semantics=("parallel", "parallel"),
            vmem_limit_bytes=vmem_limit,
        ),
        input_output_aliases={0: 0},
        cost_estimate=cost,
    )(x, y3)


# ---------------------------------------------------------------------------
# Public entry point.
# ---------------------------------------------------------------------------
def se_layer(inp, w1, w2, batch_size):
    """SELayer forward.

    inp: (M, C) point features; w1: (C//r, C); w2: (C, C//r)  (PyTorch
    nn.Linear weight layout, no bias).  Returns (M, C) == (B*L, C).
    """
    m_rows, dim = inp.shape
    assert m_rows % batch_size == 0, "rows must divide evenly by batch_size"
    l_true = m_rows // batch_size
    c_r = w1.shape[0]

    # Same raw .view() reshape as PyTorch: (M, C) -> (B, C, L).  No padding and
    # no post-slice: the fused block's last two dims equal the full array dims,
    # which is legal for any L (the final partial lane group uses masked stores).
    x = inp.reshape(batch_size, dim, l_true)

    itemsize = jnp.dtype(inp.dtype).itemsize
    block_bytes = dim * l_true * itemsize
    w_bytes = 2 * dim * c_r * 4
    budget = _vmem_budget_bytes()
    fused_need = 4 * block_bytes + w_bytes + (2 << 20)  # dbl-buffered in+out + resident weights + headroom

    # Single pass (1R + 1W) when a whole (C, L) slice fits the VMEM budget and
    # there are either enough grid steps for the pipeline to overlap DMA with
    # compute or the per-step blocks are small.  Otherwise fall back to the
    # two-pass tiled schedule (2R + 1W, scales to any L, keeps both v7x cores fed).
    use_fused = fused_need <= budget and (batch_size >= 4 or block_bytes <= (2 << 20))
    if use_fused:
        vmem_limit = int(min(max(fused_need, 16 << 20), budget))
        out = _se_fused(
            x,
            jnp.asarray(w1.T, jnp.float32),   # cast once in the wrapper; resident
            jnp.asarray(w2, jnp.float32),
            vmem_limit=vmem_limit,
        )
    else:
        out = _se_two_pass(x, w1, w2, budget=budget)

    return out.reshape(-1, dim)


def se_layer_ref(inp, w1, w2, batch_size):
    m_rows, dim = inp.shape
    L = m_rows // batch_size
    x = inp.reshape(batch_size, dim, L)
    m = x.mean(axis=-1)                                    # (B, C)
    h = jnp.maximum(m @ w1.T, 0.0)                         # (B, C//r)
    y = jax.nn.sigmoid(h @ w2.T)                           # (B, C)
    return (x * y[:, :, None]).reshape(-1, dim)


if __name__ == "__main__":
    B = 2
    C = 64          # channel
    reduction = 8   # hidden = C // reduction = 8
    L = 512         # points per batch element
    M = B * L       # rows of the (M, C) point-feature matrix

    key = jax.random.PRNGKey(0)
    k_x, k_w1, k_w2 = jax.random.split(key, 3)
    x = jax.random.normal(k_x, (M, C), dtype=jnp.float32)
    w1 = jax.random.normal(k_w1, (C // reduction, C), dtype=jnp.float32) * 0.1
    w2 = jax.random.normal(k_w2, (C, C // reduction), dtype=jnp.float32) * 0.1

    # Fused single-pass path.
    out = jax.block_until_ready(se_layer(x, w1, w2, B))
    ref = se_layer_ref(x, w1, w2, B)
    assert out.shape == (M, C)
    assert jnp.allclose(out, ref, atol=1e-5, rtol=1e-5)

    # Also exercise the tiled two-pass fallback (large-L / small-B path), with a
    # small L that is not a multiple of the tile so the masked boundary tile runs.
    L2 = 320
    x2 = jax.random.normal(k_x, (B * L2, C), dtype=jnp.float32)
    out2 = jax.block_until_ready(
        _se_two_pass(x2.reshape(B, C, L2), w1, w2,
                     budget=_vmem_budget_bytes(), tile_l=128)
    ).reshape(-1, C)
    ref2 = se_layer_ref(x2, w1, w2, B)
    assert out2.shape == (B * L2, C)
    assert jnp.allclose(out2, ref2, atol=1e-5, rtol=1e-5)

    print("KERNEL_OK")
</pallas_src>

<mosaic_0001>
module attributes {stable_mosaic.version = 11 : i64} {
  func.func @_se_fused_kernel(%arg0: i32, %arg1: memref<1x64x512xf32, #tpu.memory_space<vmem>>, %arg2: memref<64x8xf32, #tpu.memory_space<vmem>>, %arg3: memref<64x8xf32, #tpu.memory_space<vmem>>, %arg4: memref<1x64x512xf32, #tpu.memory_space<vmem>>) attributes {dimension_semantics = [#tpu.dimension_semantics<parallel>], iteration_bounds = array<i64: 2>, scalar_prefetch = 0 : i64, scratch_operands = 0 : i64, tpu.core_type = #tpu.core_type<tc>, window_params = [{transform_indices = @transform_0, window_bounds = array<i64: 1, 64, 512>}, {pipeline_mode = #tpu.pipeline_mode<synchronous>, transform_indices = @transform_1, window_bounds = array<i64: 64, 8>}, {pipeline_mode = #tpu.pipeline_mode<synchronous>, transform_indices = @transform_2, window_bounds = array<i64: 64, 8>}, {transform_indices = @transform_3, window_bounds = array<i64: 1, 64, 512>}]} {
    %c0 = arith.constant 0 : index
    %c0_0 = arith.constant 0 : index
    %c0_1 = arith.constant 0 : index
    %0 = vector.load %arg1[%c0, %c0_0, %c0_1] : memref<1x64x512xf32, #tpu.memory_space<vmem>>, vector<1x64x512xf32>
    %1 = vector.shape_cast %0 : vector<1x64x512xf32> to vector<64x512xf32>
    %cst = arith.constant dense<0.000000e+00> : vector<64xf32>
    %2 = vector.multi_reduction <add>, %1, %cst [1] : vector<64x512xf32> to vector<64xf32>
    %3 = vector.shape_cast %2 : vector<64xf32> to vector<64x1xf32>
    %cst_2 = arith.constant 0.001953125 : f32
    %4 = vector.broadcast %cst_2 : f32 to vector<64x1xf32>
    %5 = arith.mulf %3, %4 : vector<64x1xf32>
    %c0_3 = arith.constant 0 : index
    %c0_4 = arith.constant 0 : index
    %6 = vector.load %arg2[%c0_3, %c0_4] : memref<64x8xf32, #tpu.memory_space<vmem>>, vector<64x8xf32>
    %7 = vector.broadcast %5 : vector<64x1xf32> to vector<64x8xf32>
    %8 = arith.mulf %6, %7 : vector<64x8xf32>
    %cst_5 = arith.constant dense<0.000000e+00> : vector<8xf32>
    %9 = vector.multi_reduction <add>, %8, %cst_5 [0] : vector<64x8xf32> to vector<8xf32>
    %10 = vector.shape_cast %9 : vector<8xf32> to vector<1x8xf32>
    %cst_6 = arith.constant 0.000000e+00 : f32
    %11 = vector.broadcast %cst_6 : f32 to vector<1x8xf32>
    %12 = arith.maximumf %10, %11 : vector<1x8xf32>
    %c0_7 = arith.constant 0 : index
    %c0_8 = arith.constant 0 : index
    %13 = vector.load %arg3[%c0_7, %c0_8] : memref<64x8xf32, #tpu.memory_space<vmem>>, vector<64x8xf32>
    %14 = vector.broadcast %12 : vector<1x8xf32> to vector<64x8xf32>
    %15 = arith.mulf %13, %14 : vector<64x8xf32>
    %cst_9 = arith.constant dense<0.000000e+00> : vector<64xf32>
    %16 = vector.multi_reduction <add>, %15, %cst_9 [1] : vector<64x8xf32> to vector<64xf32>
    %17 = vector.shape_cast %16 : vector<64xf32> to vector<64x1xf32>
    %18 = arith.negf %17 : vector<64x1xf32>
    %19 = math.exp %18 : vector<64x1xf32>
    %cst_10 = arith.constant 1.000000e+00 : f32
    %20 = vector.broadcast %cst_10 : f32 to vector<64x1xf32>
    %21 = arith.addf %20, %19 : vector<64x1xf32>
    %22 = arith.divf %20, %21 : vector<64x1xf32>
    %c0_11 = arith.constant 0 : index
    %c0_12 = arith.constant 0 : index
    %c0_13 = arith.constant 0 : index
    %23 = vector.load %arg1[%c0_11, %c0_12, %c0_13] : memref<1x64x512xf32, #tpu.memory_space<vmem>>, vector<1x64x512xf32>
    %24 = vector.shape_cast %23 : vector<1x64x512xf32> to vector<64x512xf32>
    %25 = vector.broadcast %22 : vector<64x1xf32> to vector<64x512xf32>
    %26 = arith.mulf %24, %25 : vector<64x512xf32>
    %c0_14 = arith.constant 0 : index
    %c0_15 = arith.constant 0 : index
    %c0_16 = arith.constant 0 : index
    %27 = vector.load %arg4[%c0_14, %c0_15, %c0_16] : memref<1x64x512xf32, #tpu.memory_space<vmem>>, vector<1x64x512xf32>
    %28 = vector.shape_cast %27 : vector<1x64x512xf32> to vector<64x512xf32>
    %29 = vector.shape_cast %26 : vector<64x512xf32> to vector<1x64x512xf32>
    tpu.vector_store %arg4[%c0_14, %c0_15, %c0_16], %29 {strides = array<i32>} : memref<1x64x512xf32, #tpu.memory_space<vmem>>, vector<1x64x512xf32>,
    return
  }
  func.func @transform_0(%arg0: i32) -> (i32, i32, i32) {
    %c0_i32 = arith.constant 0 : i32
    %c0_i32_0 = arith.constant 0 : i32
    %c0_i32_1 = arith.constant 0 : i32
    return %arg0, %c0_i32, %c0_i32_0 : i32, i32, i32
  }
  func.func @transform_1(%arg0: i32) -> (i32, i32) {
    %c0_i32 = arith.constant 0 : i32
    %c0_i32_0 = arith.constant 0 : i32
    %c0_i32_1 = arith.constant 0 : i32
    return %c0_i32, %c0_i32_0 : i32, i32
  }
  func.func @transform_2(%arg0: i32) -> (i32, i32) {
    %c0_i32 = arith.constant 0 : i32
    %c0_i32_0 = arith.constant 0 : i32
    %c0_i32_1 = arith.constant 0 : i32
    return %c0_i32, %c0_i32_0 : i32, i32
  }
  func.func @transform_3(%arg0: i32) -> (i32, i32, i32) {
    %c0_i32 = arith.constant 0 : i32
    %c0_i32_0 = arith.constant 0 : i32
    %c0_i32_1 = arith.constant 0 : i32
    return %arg0, %c0_i32, %c0_i32_0 : i32, i32, i32
  }
}

</mosaic_0001>

<bundles_post_ra>
// kernel: tpu_custom_call.1
= control target key start
LH: loop header
LB: loop body
LE: loop exit
PB: predicated region body
PF: predicated region fallthrough
CT: control target
= control target key end

     0   :  { %8 = vsyncpa [#allocation3], 0  ;;  %s1381_s0 = inlined_call_operand.hbm [shape: f32[2,64,512], index: 0, kind: input, shape index: {}, may-alias: {0,3}]   ;;  %s1382_s1 = inlined_call_operand.vmem [shape: f32[64,8], index: 1, kind: input, shape index: {}]   ;;  %s1383_s2 = inlined_call_operand.vmem [shape: f32[64,8], index: 2, kind: input, shape index: {}]   ;;  %s1384_s3 = inlined_call_operand.hbm [shape: f32[2,64,512], index: 3, kind: output, shape index: {}, may-alias: {0,3}]  }
   0x1   :  { %10 = vsyncpa [#allocation3 + $0x1], 0 }
   0x2   :  { %11 = vsyncpa [#allocation4], 0 }
   0x3   :  { %13 = vsyncpa [#allocation4 + $0x1], 0  ;;  %s883_s12 = smov 0   ;;  %s885_s13 = smov 0  }
   0x4   :  { %s887_s14 = smov 0   ;;  %s889_s15 = smov 0  }
   0x5 LB: > { %s904_s16 = sadd.s32 4294967295, %s857_s15   ;;  %s655_s17 = sadd.s32 4294967294, %s857_s15   ;;  %s857_s15 = sphi %s889_s15, %s1404_s15   ;;  %s853_s14 = sphi %s887_s14, %s1403_s14   ;;  %s849_s13 = sphi %s885_s13, %s1402_s13   ;;  %s845_s12 = sphi %s883_s12, %s1401_s12  }
   0x6   : > { %s908_s18 = sadd.s32 1, %s857_s15   ;;  %s26_s19 = sadd.s32 1, %s853_s14 }
   0x7   : > { %s23_s20 = ssub.s32 %s857_s15, %s908_s18  ;;  %p33_p0 = scmp.ne.s32.totalorder %s853_s14, %s849_s13 }
   0x8   : > { %p24_p1 = scmp.eq.s32.totalorder %s23_s20, 0  ;;  %p34_p2 = scmp.eq.s32.totalorder %s857_s15, 0 }
   0x9   : > { %p39_p3 = scmp.ne.s32.totalorder %s849_s13, %s845_s12  ;;  %p40_p4 = scmp.eq.s32.totalorder %s904_s16, 0 }
   0xa   : > { %s920_s21 = scalar_select %p24_p1, %s853_s14, %s26_s19  }
   0xb   : > { %p922_p5 = por %p34_p2, %p33_p0  ;;  %p926_p6 = por %p40_p4, %p39_p3 }
   0xc   : > { %p105_p7 = scmp.eq.s32.totalorder %s904_s16, 1  ;;  %p111_p8 = scmp.eq.s32.totalorder %s655_s17, 1 }
   0xd   : > { %p691_p10 = scmp.lt.s32.totalorder %s857_s15, 2  ;;  %s137_s26 = sand.u32 1, %s853_s14  }
   0xe   : > { %p933_p11 = por %p105_p7, %p33_p0  ;;  %p937_p12 = por %p111_p8, %p39_p3 }
   0xf   : > { %s677_s27 = sshll.u32 %s857_s15, 8  ;;  %s658_s28 = sshll.u32 %s137_s26, 8 }
  0x10   : > { %s146_s4 = scalar_lea.hbm %s1381_s0, %s677_s27  ;;  %s141_s6 = scalar_lea.vmem [#allocation2], %s658_s28 }
  0x11   : > { %s147_s5 = sshll.u32 %s146_s4, 4  ;;  %s149_s7 = sshll.u32 %s141_s6, 4  ;;  %s148_s5 = int_to_ptr.hbm [resolvable:$true] %s147_s5  ;;  %s150_s7 = int_to_ptr.vmem [resolvable:$true] %s149_s7 }
  0x12   : > { %p948_p13 = pnand %p691_p10, %p922_p5  ;;  %p661_p0 = scmp.ge.s32.totalorder %s857_s15, 1 }
  0x13   : > { %p157_p1 = scmp.lt.s32.totalorder %s857_s15, 3  ;;  %s138_s9 = scalar_lea.sflag [#allocation3], %s137_s26 }
  0x14   : > { %s761_s10 = sshra.s32 %s148_s5, 4  ;;  %p765_p3 = pneg %p948_p13  ;;  %s762_s10 = int_to_ptr.hbm [resolvable:$true] %s761_s10 }
  0x15   : > { %s763_s11 = scalar_lea.hbm %s762_s10, 256  ;;  %s768_s20 = scalar_lea.hbm %s1381_s0, 512 }
  0x16   : > { %p764_p2 = scmp.ne.s32.totalorder %s762_s10, %s763_s11  ;;  %p769_p5 = scmp.lt.s32.totalorder %s762_s10, %s1381_s0 }
  0x17   : > { %p770_p8 = scmp.lt.s32.totalorder %s768_s20, %s763_s11 }
  0x18   : > { %p766_p4 = pnand %p765_p3, %p764_p2 }
  0x19   : > { %p771_p10 = por %p770_p8, %p769_p5 }
  0x1a   : > { %p767_p7 = pneg %p766_p4 }
  0x1c   : > { %p772_p9 = pnand %p771_p10, %p767_p7 }
  0x1e   : > { %775 = shalt.err (!%p772_p9)
}
  0x1f   : > { %s859_s26 = smov 512   ;;  %s860_s28 = smov 32  }
  0x20   : > { %686 = dma.hbm_to_vmem [thread:$0]  (!%p948_p13), %s148_s5, 4096, %s150_s7, %s138_s9, %s859_s26, %s859_s26, %s860_s28  }
  0x21   : > { %p158_p2 = pnand %p661_p0, %p157_p1 }
  0x22   : > { %s969_s29 = sand.u32 (!%p158_p2), 1, %s849_s13  }
  0x23   : > { %161 = sbr.rel (%p158_p2) target bundleno = 390 (0x186), region = 32  ;;  %s662_s30 = sshll.u32 (!%p158_p2), %s969_s29, 8 }
  0x24   : > { %s164_s4 = scalar_lea.sflag (!%p158_p2), [#allocation3], %s969_s29  ;;  %s975_s6 = scalar_lea.vmem (!%p158_p2), [#allocation2], %s662_s30 }
  0x28   : > { %836 = dma.done.wait (%p926_p6), %s164_s4, 4096  }
  0x29   : > { %838 = vsyncadd (%p926_p6), %s164_s4, 4294963200  ;;  %v982_v0 = vld [vmem:[%s975_s6] sm:$0xff]  ;;  %v985_v1 = vld [vmem:[%s975_s6 + $0x8] sm:$0xff]  ;;  %vm287_vm0 = vcmask 64512   ;;  %s1221_s23 = scalar_lea.vmem [#allocation5], %s662_s30  ;;  %s678_s30 = sshll.u32 %s904_s16, 8 }
  0x2a   : > { %v988_v2 = vld [vmem:[%s975_s6 + $0x10] sm:$0xff]  ;;  %v223_v3 = vadd.f32 %v985_v1, %v982_v0  ;;  %v993_v4 = vld [vmem:[%s975_s6 + $0x40] sm:$0xff]  ;;  %v996_v5 = vld [vmem:[%s975_s6 + $0x48] sm:$0xff]  ;;  %s578_s7 = scalar_lea.hbm %s1384_s3, %s678_s30  ;;  %s579_s8 = sshll.u32 %s1221_s23, 4  ;;  %s580_s8 = int_to_ptr.vmem [resolvable:$true] %s579_s8 }
  0x2b   : > { %v999_v6 = vld [vmem:[%s975_s6 + $0x18] sm:$0xff]  ;;  %v1002_v7 = vld [vmem:[%s975_s6 + $0x50] sm:$0xff]  ;;  %v233_v8 = vadd.f32 %v996_v5, %v993_v4  ;;  %v1007_v9 = vld [vmem:[%s975_s6 + $0x80] sm:$0xff]  ;;  %s581_s9 = sshll.u32 %s578_s7, 4  ;;  %s567_s10 = scalar_lea.sflag [#allocation4], %s969_s29  ;;  %s582_s9 = int_to_ptr.hbm [resolvable:$true] %s581_s9 }
  0x2c   : > { %v224_v10 = vadd.f32 %v223_v3, %v988_v2  ;;  %v1011_v11 = vld [vmem:[%s975_s6 + $0x58] sm:$0xff]  ;;  %v1014_v12 = vld [vmem:[%s975_s6 + $0x88] sm:$0xff]  ;;  %v1017_v13 = vld [vmem:[%s975_s6 + $0x90] sm:$0xff]  ;;  %s805_s11 = sshra.s32 %s582_s9, 4  ;;  %s811_s22 = scalar_lea.hbm %s1384_s3, 512  ;;  %s806_s11 = int_to_ptr.hbm [resolvable:$true] %s805_s11 }
  0x2d   : > { %v234_v14 = vadd.f32 %v233_v8, %v1002_v7  ;;  %v243_v15 = vadd.f32 %v1014_v12, %v1007_v9  ;;  %v1023_v16 = vld [vmem:[%s975_s6 + $0x20] sm:$0xff]  ;;  %v1026_v17 = vld [vmem:[%s975_s6 + $0x28] sm:$0xff]  ;;  %v1029_v18 = vld [vmem:[%s975_s6 + $0x30] sm:$0xff]  ;;  %s807_s17 = scalar_lea.hbm %s806_s11, 256  ;;  %p812_p0 = scmp.lt.s32.totalorder %s806_s11, %s1384_s3 }
  0x2e   : > { %v225_v19 = vadd.f32 %v224_v10, %v999_v6  ;;  %v1033_v20 = vld [vmem:[%s975_s6 + $0x98] sm:$0xff]  ;;  %v228_v21 = vadd.f32 %v1026_v17, %v1023_v16  ;;  %v1038_v22 = vld [vmem:[%s975_s6 + $0x60] sm:$0xff]  ;;  %v1041_v23 = vld [vmem:[%s975_s6 + $0x68] sm:$0xff]  ;;  %p808_p6 = scmp.ne.s32.totalorder %s806_s11, %s807_s17  ;;  %p813_p1 = scmp.lt.s32.totalorder %s811_s22, %s807_s17 }
  0x2f   : > { %v235_v24 = vadd.f32 %v234_v14, %v1011_v11  ;;  %v244_v25 = vadd.f32 %v243_v15, %v1017_v13  ;;  %v1046_v26 = vld [vmem:[%s975_s6 + $0x70] sm:$0xff]  ;;  %v238_v27 = vadd.f32 %v1041_v23, %v1038_v22  ;;  %v1051_v28 = vld [vmem:[%s975_s6 + $0xa0] sm:$0xff]  ;;  %v1055_v30 = vld [vmem:[%s975_s6 + $0xa8] sm:$0xff] }
  0x30   : > { %226 = vadd.xlane.f32.xlu0 %v225_v19  ;;  %v229_v29 = vadd.f32 %v228_v21, %v1029_v18  ;;  %v1058_v31 = vld [vmem:[%s975_s6 + $0xb0] sm:$0xff]  ;;  %v1062_v33 = vld [vmem:[%s975_s6 + $0x38] sm:$0xff]  ;;  %v248_v35 = vadd.f32 %v1055_v30, %v1051_v28  ;;  %v1068_v36 = vld [vmem:[%s975_s6 + $0xc0] sm:$0xff]  ;;  %p809_p9 = pnand %p808_p6, %p933_p11  ;;  %p814_p3 = por %p813_p1, %p812_p0 }
  0x31   : > { %236 = vadd.xlane.f32.xlu1 %v235_v24  ;;  %v245_v32 = vadd.f32 %v244_v25, %v1033_v20  ;;  %v239_v34 = vadd.f32 %v238_v27, %v1046_v26  ;;  %v1071_v37 = vld [vmem:[%s975_s6 + $0xc8] sm:$0xff]  ;;  %v1074_v38 = vld [vmem:[%s975_s6 + $0x78] sm:$0xff]  ;;  %v1077_v39 = vld [vmem:[%s975_s6 + $0xe0] sm:$0xff] }
  0x32   : > { %v1080_v40 = vld [vmem:[%s975_s6 + $0xe8] sm:$0xff]  ;;  %v249_v41 = vadd.f32 %v248_v35, %v1058_v31  ;;  %v230_v42 = vadd.f32 %v229_v29, %v1062_v33  ;;  %v1085_v43 = vld [vmem:[%s975_s6 + $0xb8] sm:$0xff]  ;;  %v253_v44 = vadd.f32 %v1071_v37, %v1068_v36  ;;  %v1091_v46 = vld [vmem:[%s975_s6 + $0xd0] sm:$0xff]  ;;  %p810_p13 = pneg %p809_p9 }
  0x33   : > { %246 = vadd.xlane.f32.xlu2 %v245_v32  ;;  %v240_v45 = vadd.f32 %v239_v34, %v1074_v38  ;;  %v258_v47 = vadd.f32 %v1080_v40, %v1077_v39  ;;  %v1096_v48 = vld [vmem:[%s975_s6 + $0xf0] sm:$0xff]  ;;  %v1101_v51 = vld [vmem:[%s975_s6 + $0xd8] sm:$0xff]  ;;  %v271_v60 = vld [vmem:[%s1382_s1] sm:$0xff] }
  0x34   : > { %v250_v49 = vadd.f32 %v249_v41, %v1085_v43  ;;  %v254_v50 = vadd.f32 %v253_v44, %v1091_v46  ;;  %v1105_v53 = vld [vmem:[%s975_s6 + $0xf8] sm:$0xff]  ;;  %v273_v62 = vld [vmem:[%s1382_s1 + $0x10] sm:$0xff]  ;;  %v272_v63 = vld [vmem:[%s1382_s1 + $0x8] sm:$0xff]  ;;  %p815_p4 = pnand %p814_p3, %p810_p13 }
  0x35   : > { %v259_v52 = vadd.f32 %v258_v47, %v1096_v48  ;;  %v274_v14 = vld [vmem:[%s1382_s1 + $0x18] sm:$0xff]  ;;  %v275_v29 = vld [vmem:[%s1382_s1 + $0x20] sm:$0xff]  ;;  %v276_v34 = vld [vmem:[%s1382_s1 + $0x28] sm:$0xff] }
  0x36   : > { %v255_v54 = vadd.f32 %v254_v50, %v1101_v51 }
  0x37   : > { %v260_v55 = vadd.f32 %v259_v52, %v1105_v53 }
  0x38   : > { %231 = vadd.xlane.f32.xlu0 %v230_v42 }
  0x39   : > { %241 = vadd.xlane.f32.xlu1 %v240_v45 }
  0x3b   : > { %251 = vadd.xlane.f32.xlu2 %v250_v49 }
  0x40   : > { %256 = vadd.xlane.f32.xlu0 %v255_v54  ;;  %v277_v54 = vld [vmem:[%s1382_s1 + $0x30] sm:$0xff] }
  0x41   : > { %261 = vadd.xlane.f32.xlu1 %v260_v55 }
  0xa3   : > { %v227_v56 = vpop.xlane.xlu0 %226 }
  0xa4   : > { %v237_v57 = vpop.xlane.xlu1 %236  ;;  %v263_v59 = vmul.f32 0.001953125, %v227_v56 }
  0xa5   : > { %v265_v61 = vmul.f32 0.001953125, %v237_v57  ;;  %v278_v57 = vld [vmem:[%s1382_s1 + $0x38] sm:$0xff] }
  0xa6   : > { %v247_v58 = vpop.xlane.xlu2 %246  ;;  %v279_v8 = vmul.f32 %v271_v60, %v263_v59 }
  0xa7   : > { %v281_v21 = vmul.f32 %v273_v62, %v265_v61  ;;  %v267_v24 = vmul.f32 0.001953125, %v247_v58 }
  0xa8   : > { %v288_v41 = vsel %vm287_vm0, %v279_v8, 0.0 }
  0xa9   : > { %v291_v45 = vsel %vm287_vm0, %v281_v21, 0.0  ;;  %v283_v47 = vmul.f32 %v275_v29, %v267_v24 }
  0xab   : > { %v232_v3 = vpop.xlane.xlu0 %231  ;;  %v295_v61 = vsel %vm287_vm0, %v283_v47, 0.0 }
  0xac   : > { %v264_v10 = vmul.f32 0.001953125, %v232_v3  ;;  %v242_v15 = vpop.xlane.xlu1 %241 }
  0xad   : > { %v266_v19 = vmul.f32 0.001953125, %v242_v15 }
  0xae   : > { %v280_v25 = vmul.f32 %v272_v63, %v264_v10  ;;  %v252_v27 = vpop.xlane.xlu2 %251 }
  0xaf   : > { %v282_v32 = vmul.f32 %v274_v14, %v266_v19  ;;  %v268_v35 = vmul.f32 0.001953125, %v252_v27 }
  0xb0   : > { %v289_v42 = vsel %vm287_vm0, %v280_v25, 0.0 }
  0xb1   : > { %v290_v44 = vadd.f32 %v289_v42, %v288_v41  ;;  %v293_v49 = vsel %vm287_vm0, %v282_v32, 0.0  ;;  %v284_v50 = vmul.f32 %v276_v34, %v268_v35  ;;  %v312_v35 = vld [vmem:[%s1383_s2 + $0x10] sm:$0xff]  ;;  %v311_v41 = vld [vmem:[%s1383_s2 + $0x8] sm:$0xff]  ;;  %v310_v42 = vld [vmem:[%s1383_s2] sm:$0xff] }
  0xb3   : > { %v292_v52 = vadd.f32 %v291_v45, %v290_v44  ;;  %v257_v55 = vpop.xlane.xlu0 %256  ;;  %v297_v62 = vsel %vm287_vm0, %v284_v50, 0.0 }
  0xb4   : > { %v269_v56 = vmul.f32 0.001953125, %v257_v55  ;;  %v262_v58 = vpop.xlane.xlu1 %261  ;;  %v315_v55 = vld [vmem:[%s1383_s2 + $0x28] sm:$0xff] }
  0xb5   : > { %v294_v59 = vadd.f32 %v293_v49, %v292_v52  ;;  %v270_v60 = vmul.f32 0.001953125, %v262_v58 }
  0xb6   : > { %v285_v63 = vmul.f32 %v277_v54, %v269_v56  ;;  %v314_v56 = vld [vmem:[%s1383_s2 + $0x20] sm:$0xff] }
  0xb7   : > { %v296_v3 = vadd.f32 %v295_v61, %v294_v59  ;;  %v286_v8 = vmul.f32 %v278_v57, %v270_v60  ;;  %v313_v57 = vld [vmem:[%s1383_s2 + $0x18] sm:$0xff] }
  0xb8   : > { %v299_v10 = vsel %vm287_vm0, %v285_v63, 0.0 }
  0xb9   : > { %v298_v14 = vadd.f32 %v297_v62, %v296_v3  ;;  %v301_v15 = vsel %vm287_vm0, %v286_v8, 0.0  ;;  %v317_v3 = vld [vmem:[%s1383_s2 + $0x38] sm:$0xff]  ;;  %v316_v8 = vld [vmem:[%s1383_s2 + $0x30] sm:$0xff] }
  0xbb   : > { %v300_v19 = vadd.f32 %v299_v10, %v298_v14 }
  0xbd   : > { %v302_v21 = vadd.f32 %v301_v15, %v300_v19 }
  0xbf   : > { %v303_v24 = vrot.slane %v302_v21, 4 }
  0xc1   : > { %v304_v25 = vadd.f32 %v303_v24, %v302_v21 }
  0xc3   : > { %v305_v27 = vrot.slane %v304_v25, 2 }
  0xc5   : > { %v306_v29 = vadd.f32 %v305_v27, %v304_v25 }
  0xc7   : > { %v307_v32 = vrot.slane %v306_v29, 1 }
  0xc9   : > { %v308_v34 = vadd.f32 %v307_v32, %v306_v29 }
  0xcb   : > { %v309_v44 = vmax.f32 %v308_v34, 0.0 }
  0xcd   : > { %v320_v45 = vmul.f32 %v312_v35, %v309_v44  ;;  %v319_v47 = vmul.f32 %v311_v41, %v309_v44  ;;  %v318_v49 = vmul.f32 %v310_v42, %v309_v44  ;;  %v323_v58 = vmul.f32 %v315_v55, %v309_v44 }
  0xce   : > { %v322_v59 = vmul.f32 %v314_v56, %v309_v44  ;;  %v321_v60 = vmul.f32 %v313_v57, %v309_v44  ;;  %v325_v10 = vmul.f32 %v317_v3, %v309_v44  ;;  %v324_v14 = vmul.f32 %v316_v8, %v309_v44 }
  0xcf   : > { %v332_v50 = vsel %vm287_vm0, %v320_v45, 0.0  ;;  %v329_v52 = vsel %vm287_vm0, %v319_v47, 0.0  ;;  %v326_v54 = vsel %vm287_vm0, %v318_v49, 0.0  ;;  %v341_v61 = vsel %vm287_vm0, %v323_v58, 0.0 }
  0xd0   : > { %333 = vadd.xlane.f32.xlu1 %v332_v50  ;;  %330 = vadd.xlane.f32.xlu0 %v329_v52  ;;  %v338_v62 = vsel %vm287_vm0, %v322_v59, 0.0  ;;  %v335_v63 = vsel %vm287_vm0, %v321_v60, 0.0  ;;  %v347_v15 = vsel %vm287_vm0, %v325_v10, 0.0  ;;  %v344_v19 = vsel %vm287_vm0, %v324_v14, 0.0 }
  0xd1   : > { %327 = vadd.xlane.f32.xlu2 %v326_v54 }
  0xd8   : > { %342 = vadd.xlane.f32.xlu1 %v341_v61  ;;  %339 = vadd.xlane.f32.xlu0 %v338_v62 }
  0xd9   : > { %336 = vadd.xlane.f32.xlu2 %v335_v63 }
  0xe0   : > { %348 = vadd.xlane.f32.xlu0 %v347_v15 }
  0xe1   : > { %345 = vadd.xlane.f32.xlu2 %v344_v19 }
 0x143   : > { %v334_v21 = vpop.xlane.xlu1 %333  ;;  %v331_v24 = vpop.xlane.xlu0 %330 }
 0x144   : > { %v666_v25 = vmul.f32 -1.442695, %v334_v21  ;;  %v665_v27 = vmul.f32 -1.442695, %v331_v24  ;;  %v328_v29 = vpop.xlane.xlu2 %327 }
 0x145   : > { %v664_v32 = vmul.f32 -1.442695, %v328_v29 }
 0x146   : > { %729 = vpow2.f32 %v666_v25 }
 0x147   : > { %731 = vpow2.f32 %v665_v27 }
 0x148   : > { %733 = vpow2.f32 %v664_v32 }
 0x14b   : > { %v343_v34 = vpop.xlane.xlu1 %342  ;;  %v340_v35 = vpop.xlane.xlu0 %339 }
 0x14c   : > { %v730_v41 = vpop.eup %729  ;;  %v669_v42 = vmul.f32 -1.442695, %v343_v34  ;;  %v337_v44 = vpop.xlane.xlu2 %336  ;;  %v668_v49 = vmul.f32 -1.442695, %v340_v35 }
 0x14d   : > { %v732_v45 = vpop.eup %731  ;;  %v376_v47 = vadd.f32 1.0, %v730_v41  ;;  %v667_v54 = vmul.f32 -1.442695, %v337_v44 }
 0x14e   : > { %v734_v50 = vpop.eup %733  ;;  %v375_v52 = vadd.f32 1.0, %v732_v45  ;;  %735 = vpow2.f32 %v669_v42 }
 0x14f   : > { %737 = vrcp.f32 %v376_v47  ;;  %v1173_v55 = vadd.f32 1.0, %v734_v50  ;;  %v421_v56 = vand.u32 2147483647, %v376_v47  ;;  %v423_v57 = vand.u32 2147483648, %v376_v47 }
 0x150   : > { %739 = vrcp.f32 %v375_v52  ;;  %v406_v59 = vand.u32 2147483647, %v375_v52  ;;  %v408_v61 = vand.u32 2147483648, %v375_v52  ;;  %vm417_vm1 = vweird.f32 %v376_v47 }
 0x151   : > { %741 = vpow2.f32 %v668_v49  ;;  %vm402_vm2 = vweird.f32 %v375_v52  ;;  %vm1178_vm3 = vcmp.eq.f32.partialorder %v421_v56, 8.507059e+37  ;;  %v424_v15 = vor.u32 1.1754944e-38, %v423_v57 }
 0x152   : > { %743 = vpow2.f32 %v667_v54  ;;  %vm1183_vm4 = vcmp.eq.f32.partialorder %v406_v59, 8.507059e+37  ;;  %v409_v41 = vor.u32 1.1754944e-38, %v408_v61  ;;  %v391_v42 = vand.u32 2147483647, %v1173_v55 }
 0x153   : > { %745 = vrcp.f32 %v1173_v55  ;;  %v349_v63 = vpop.xlane.xlu0 %348  ;;  %vm387_vm6 = vweird.f32 %v1173_v55 }
 0x154   : > { %v736_v58 = vpop.eup %735  ;;  %v671_v29 = vmul.f32 -1.442695, %v349_v63  ;;  %v346_v32 = vpop.xlane.xlu2 %345  ;;  %vm1199_vm9 = vcmp.eq.f32.partialorder %v391_v42, 8.507059e+37 }
 0x155   : > { %v738_v60 = vpop.eup %737  ;;  %v1176_v62 = vadd.f32 1.0, %v736_v58  ;;  %v670_v54 = vmul.f32 -1.442695, %v346_v32  ;;  %v393_v58 = vand.u32 2147483648, %v1173_v55 }
 0x156   : > { %v740_v3 = vpop.eup %739  ;;  %v413_v8 = vmul.f32 %v738_v60, %v376_v47  ;;  %vm418_vm5 = vweird.f32 %v738_v60 }
 0x157   : > { %v742_v10 = vpop.eup %741  ;;  %v398_v19 = vmul.f32 %v740_v3, %v375_v52  ;;  %747 = vrcp.f32 %v1176_v62  ;;  %vm403_vm7 = vweird.f32 %v740_v3  ;;  %vm419_vm8 = vmor %vm417_vm1, %vm418_vm5  ;;  %v468_v47 = vand.u32 2147483648, %v1176_v62 }
 0x158   : > { %v744_v21 = vpop.eup %743  ;;  %v414_v24 = vsub.f32 1.0, %v413_v8  ;;  %v1187_v27 = vadd.f32 1.0, %v742_v10  ;;  %v466_v8 = vand.u32 2147483647, %v1176_v62  ;;  %vm404_vm10 = vmor %vm402_vm2, %vm403_vm7  ;;  %vm462_vm13 = vweird.f32 %v1176_v62 }
 0x159   : > { %v746_v34 = vpop.eup %745  ;;  %v399_v35 = vsub.f32 1.0, %v398_v19  ;;  %v1190_v44 = vadd.f32 1.0, %v744_v21 }
 0x15a   : > { %v415_v45 = vmul.f32 %v738_v60, %v414_v24  ;;  %v383_v49 = vmul.f32 %v746_v34, %v1173_v55  ;;  %749 = vrcp.f32 %v1187_v27  ;;  %vm388_vm11 = vweird.f32 %v746_v34 }
 0x15b   : > { %v400_v50 = vmul.f32 %v740_v3, %v399_v35  ;;  %751 = vpow2.f32 %v671_v29  ;;  %vm389_vm12 = vmor %vm387_vm6, %vm388_vm11  ;;  %vm1229_vm14 = vcmp.eq.f32.partialorder %v466_v8, 8.507059e+37  ;;  %vm432_vm5 = vweird.f32 %v1190_v44 }
 0x15c   : > { %v416_v56 = vadd.f32 %v738_v60, %v415_v45  ;;  %v384_v57 = vsub.f32 1.0, %v383_v49  ;;  %753 = vrcp.f32 %v1190_v44 }
 0x15d   : > { %v1196_v59 = vpop.eup %747  ;;  %v401_v61 = vadd.f32 %v740_v3, %v400_v50  ;;  %755 = vpow2.f32 %v670_v54 }
 0x15e   : > { %v420_v10 = vsel %vm419_vm8, %v738_v60, %v416_v56  ;;  %v385_v19 = vmul.f32 %v746_v34, %v384_v57  ;;  %v458_v21 = vmul.f32 %v1196_v59, %v1176_v62  ;;  %v394_v60 = vor.u32 1.1754944e-38, %v393_v58 }
 0x15f   : > { %v425_v24 = vsel %vm1178_vm3, %v424_v15, %v420_v10  ;;  %v405_v29 = vsel %vm404_vm10, %v740_v3, %v401_v61  ;;  %vm463_vm15 = vweird.f32 %v1196_v59  ;;  %v453_v58 = vand.u32 2147483648, %v1187_v27 }
 0x160   : > { %v510_v32 = vmul.f32 %v425_v24, %v993_v4  ;;  %v511_v35 = vmul.f32 %v425_v24, %v996_v5  ;;  %v512_v52 = vmul.f32 %v425_v24, %v1002_v7  ;;  %v1214_v42 = vpop.eup %749  ;;  %v513_v45 = vmul.f32 %v425_v24, %v1011_v11  ;;  %vm464_vm1 = vmor %vm462_vm13, %vm463_vm15 }
 0x161   : > { %v410_v49 = vsel %vm1183_vm4, %v409_v41, %v405_v29  ;;  %v386_v50 = vadd.f32 %v746_v34, %v385_v19  ;;  %v459_v14 = vsub.f32 1.0, %v458_v21  ;;  %v752_v15 = vpop.eup %751  ;;  %v469_v7 = vor.u32 1.1754944e-38, %v468_v47 }
 0x162   : > { %542 = vst [vmem:[%s1221_s23 + $0x40] sm:$0xff] %v510_v32  ;;  %v506_v4 = vmul.f32 %v410_v49, %v1023_v16  ;;  %v1233_v11 = vpop.eup %753  ;;  %v507_v3 = vmul.f32 %v410_v49, %v1026_v17  ;;  %v443_v55 = vmul.f32 %v1214_v42, %v1187_v27  ;;  %v508_v41 = vmul.f32 %v410_v49, %v1029_v18 }
 0x163   : > { %543 = vst [vmem:[%s1221_s23 + $0x48] sm:$0xff] %v511_v35  ;;  %v390_v25 = vsel %vm389_vm12, %v746_v34, %v386_v50  ;;  %v460_v16 = vmul.f32 %v1196_v59, %v459_v14  ;;  %v428_v56 = vmul.f32 %v1233_v11, %v1190_v44  ;;  %v756_v57 = vpop.eup %755  ;;  %v509_v17 = vmul.f32 %v410_v49, %v1062_v33 }
 0x164   : > { %544 = vst [vmem:[%s1221_s23 + $0x50] sm:$0xff] %v512_v52  ;;  %v395_v54 = vsel %vm1199_vm9, %v394_v60, %v390_v25  ;;  %vm448_vm0 = vweird.f32 %v1214_v42  ;;  %v451_v34 = vand.u32 2147483647, %v1187_v27  ;;  %v444_v63 = vsub.f32 1.0, %v443_v55 }
 0x165   : > { %545 = vst [vmem:[%s1221_s23 + $0x58] sm:$0xff] %v513_v45  ;;  %v502_v18 = vmul.f32 %v395_v54, %v982_v0  ;;  %v461_v61 = vadd.f32 %v1196_v59, %v460_v16  ;;  %v429_v8 = vsub.f32 1.0, %v428_v56  ;;  %v503_v10 = vmul.f32 %v395_v54, %v985_v1 }
 0x166   : > { %538 = vst [vmem:[%s1221_s23 + $0x20] sm:$0xff] %v506_v4  ;;  %v504_v33 = vmul.f32 %v395_v54, %v988_v2  ;;  %vm433_vm2 = vweird.f32 %v1233_v11  ;;  %v1263_v19 = vadd.f32 1.0, %v752_v15  ;;  %v445_v21 = vmul.f32 %v1214_v42, %v444_v63 }
 0x167   : > { %539 = vst [vmem:[%s1221_s23 + $0x28] sm:$0xff] %v507_v3  ;;  %v465_v0 = vsel %vm464_vm1, %v1196_v59, %v461_v61  ;;  %v430_v47 = vmul.f32 %v1233_v11, %v429_v8  ;;  %v1269_v1 = vadd.f32 1.0, %v756_v57  ;;  %v505_v2 = vmul.f32 %v395_v54, %v999_v6  ;;  %vm434_vm7 = vmor %vm432_vm5, %vm433_vm2 }
 0x168   : > { %540 = vst [vmem:[%s1221_s23 + $0x30] sm:$0xff] %v508_v41  ;;  %v470_v62 = vsel %vm1229_vm14, %v469_v7, %v465_v0  ;;  %v438_v24 = vand.u32 2147483648, %v1190_v44  ;;  %757 = vrcp.f32 %v1263_v19  ;;  %vm447_vm3 = vweird.f32 %v1187_v27 }
 0x169   : > { %541 = vst [vmem:[%s1221_s23 + $0x38] sm:$0xff] %v509_v17  ;;  %v522_v59 = vmul.f32 %v470_v62, %v1051_v28  ;;  %v436_v29 = vand.u32 2147483647, %v1190_v44  ;;  %v523_v32 = vmul.f32 %v470_v62, %v1055_v30  ;;  %v446_v6 = vadd.f32 %v1214_v42, %v445_v21  ;;  %vm1286_vm4 = vmor %vm447_vm3, %vm448_vm0 }
 0x16a   : > { %534 = vst [vmem:[%s1221_s23] sm:$0xff] %v502_v18  ;;  %v431_v52 = vadd.f32 %v1233_v11, %v430_v47  ;;  %v524_v28 = vmul.f32 %v470_v62, %v1058_v31  ;;  %vm452_vm6 = vcmp.eq.f32.partialorder %v451_v34, 8.507059e+37  ;;  %v454_v27 = vor.u32 1.1754944e-38, %v453_v58 }
 0x16b   : > { %535 = vst [vmem:[%s1221_s23 + $0x8] sm:$0xff] %v503_v10  ;;  %759 = vrcp.f32 %v1269_v1  ;;  %v525_v30 = vmul.f32 %v470_v62, %v1085_v43  ;;  %v450_v44 = vsel %vm1286_vm4, %v1214_v42, %v446_v6  ;;  %v439_v31 = vor.u32 1.1754944e-38, %v438_v24 }
 0x16c   : > { %536 = vst [vmem:[%s1221_s23 + $0x10] sm:$0xff] %v504_v33  ;;  %v435_v60 = vsel %vm434_vm7, %v1233_v11, %v431_v52  ;;  %v455_v45 = vsel %vm452_vm6, %v454_v27, %v450_v44  ;;  %vm437_vm8 = vcmp.eq.f32.partialorder %v436_v29, 8.507059e+37  ;;  %v498_v3 = vand.u32 2147483648, %v1263_v19 }
 0x16d   : > { %537 = vst [vmem:[%s1221_s23 + $0x18] sm:$0xff] %v505_v2  ;;  %v518_v50 = vmul.f32 %v455_v45, %v1007_v9  ;;  %v519_v14 = vmul.f32 %v455_v45, %v1014_v12  ;;  %v440_v43 = vsel %vm437_vm8, %v439_v31, %v435_v60  ;;  %v520_v42 = vmul.f32 %v455_v45, %v1017_v13 }
 0x16e   : > { %554 = vst [vmem:[%s1221_s23 + $0xa0] sm:$0xff] %v522_v59  ;;  %v758_v49 = vpop.eup %757  ;;  %v521_v15 = vmul.f32 %v455_v45, %v1033_v20  ;;  %v514_v7 = vmul.f32 %v440_v43, %v1038_v22  ;;  %v515_v9 = vmul.f32 %v440_v43, %v1041_v23  ;;  %v516_v13 = vmul.f32 %v440_v43, %v1046_v26 }
 0x16f   : > { %555 = vst [vmem:[%s1221_s23 + $0xa8] sm:$0xff] %v523_v32  ;;  %v488_v4 = vmul.f32 %v758_v49, %v1263_v19  ;;  %v496_v20 = vand.u32 2147483647, %v1263_v19  ;;  %v517_v25 = vmul.f32 %v440_v43, %v1074_v38  ;;  %vm493_vm9 = vweird.f32 %v758_v49 }
 0x170   : > { %556 = vst [vmem:[%s1221_s23 + $0xb0] sm:$0xff] %v524_v28  ;;  %vm492_vm10 = vweird.f32 %v1263_v19  ;;  %v483_v26 = vand.u32 2147483648, %v1269_v1  ;;  %v499_v41 = vor.u32 1.1754944e-38, %v498_v3  ;;  %v481_v54 = vand.u32 2147483647, %v1269_v1 }
 0x171   : > { %557 = vst [vmem:[%s1221_s23 + $0xb8] sm:$0xff] %v525_v30  ;;  %v760_v5 = vpop.eup %759  ;;  %v489_v12 = vsub.f32 1.0, %v488_v4  ;;  %vm494_vm11 = vmor %vm492_vm10, %vm493_vm9  ;;  %vm497_vm13 = vcmp.eq.f32.partialorder %v496_v20, 8.507059e+37  ;;  %vm477_vm14 = vweird.f32 %v1269_v1 }
 0x172   : > { %550 = vst [vmem:[%s1221_s23 + $0x80] sm:$0xff] %v518_v50  ;;  %v473_v11 = vmul.f32 %v760_v5, %v1269_v1  ;;  %vm478_vm12 = vweird.f32 %v760_v5  ;;  %v484_v18 = vor.u32 1.1754944e-38, %v483_v26  ;;  %vm482_vm0 = vcmp.eq.f32.partialorder %v481_v54, 8.507059e+37 }
 0x173   : > { %551 = vst [vmem:[%s1221_s23 + $0x88] sm:$0xff] %v519_v14  ;;  %v490_v22 = vmul.f32 %v758_v49, %v489_v12  ;;  %vm479_vm15 = vmor %vm477_vm14, %vm478_vm12 }
 0x174   : > { %552 = vst [vmem:[%s1221_s23 + $0x90] sm:$0xff] %v520_v42  ;;  %v474_v16 = vsub.f32 1.0, %v473_v11 }
 0x175   : > { %553 = vst [vmem:[%s1221_s23 + $0x98] sm:$0xff] %v521_v15  ;;  %v491_v23 = vadd.f32 %v758_v49, %v490_v22 }
 0x176   : > { %546 = vst [vmem:[%s1221_s23 + $0x60] sm:$0xff] %v514_v7  ;;  %v475_v55 = vmul.f32 %v760_v5, %v474_v16 }
 0x177   : > { %547 = vst [vmem:[%s1221_s23 + $0x68] sm:$0xff] %v515_v9  ;;  %v495_v38 = vsel %vm494_vm11, %v758_v49, %v491_v23 }
 0x178   : > { %548 = vst [vmem:[%s1221_s23 + $0x70] sm:$0xff] %v516_v13  ;;  %v476_v56 = vadd.f32 %v760_v5, %v475_v55  ;;  %v500_v57 = vsel %vm497_vm13, %v499_v41, %v495_v38 }
 0x179   : > { %549 = vst [vmem:[%s1221_s23 + $0x78] sm:$0xff] %v517_v25  ;;  %v530_v17 = vmul.f32 %v500_v57, %v1077_v39  ;;  %v531_v34 = vmul.f32 %v500_v57, %v1080_v40  ;;  %v532_v58 = vmul.f32 %v500_v57, %v1096_v48  ;;  %v533_v61 = vmul.f32 %v500_v57, %v1105_v53 }
 0x17a   : > { %v480_v63 = vsel %vm479_vm15, %v760_v5, %v476_v56 }
 0x17b   : > { %562 = vst [vmem:[%s1221_s23 + $0xe0] sm:$0xff] %v530_v17  ;;  %v485_v39 = vsel %vm482_vm0, %v484_v18, %v480_v63 }
 0x17c   : > { %563 = vst [vmem:[%s1221_s23 + $0xe8] sm:$0xff] %v531_v34  ;;  %v526_v40 = vmul.f32 %v485_v39, %v1068_v36  ;;  %v527_v48 = vmul.f32 %v485_v39, %v1071_v37  ;;  %v528_v8 = vmul.f32 %v485_v39, %v1091_v46  ;;  %v529_v53 = vmul.f32 %v485_v39, %v1101_v51 }
 0x17d   : > { %564 = vst [vmem:[%s1221_s23 + $0xf0] sm:$0xff] %v532_v58 }
 0x17e   : > { %565 = vst [vmem:[%s1221_s23 + $0xf8] sm:$0xff] %v533_v61 }
 0x17f   : > { %558 = vst [vmem:[%s1221_s23 + $0xc0] sm:$0xff] %v526_v40 }
 0x180   : > { %559 = vst [vmem:[%s1221_s23 + $0xc8] sm:$0xff] %v527_v48 }
 0x181   : > { %560 = vst [vmem:[%s1221_s23 + $0xd0] sm:$0xff] %v528_v8 }
 0x182   : > { %561 = vst [vmem:[%s1221_s23 + $0xd8] sm:$0xff] %v529_v53 }
 0x183   : > { %818 = shalt.err (!%p815_p4)
}
 0x184   : > { %s861_s29 = smov 512   ;;  %s862_s28 = smov 32  }
 0x185   : > { %681 = dma.vmem_to_hbm [thread:$0]  (%p933_p11), %s580_s8, 4096, %s582_s9, %s567_s10, %s861_s29, %s861_s29, %s862_s28  }
 0x186 PF: > { %s596_s4 = sand.u32 1, %s845_s12   ;;  %p1400_p7 = scmp.ge.s32.totalorder %s857_s15, 2 }
 0x187   : > { %s597_s6 = scalar_lea.sflag [#allocation4], %s596_s4 }
 0x188   : > { %p688_p5 = pnand %p1400_p7, %p937_p12 }
 0x18a   : > { %p689_p8 = pneg %p688_p5 }
 0x18c   : > { %840 = dma.done.wait (%p689_p8), %s597_s6, 4096  }
 0x18d   : > { %842 = vsyncadd (%p689_p8), %s597_s6, 4294963200  ;;  %p16_p10 = scmp.ge.s32.totalorder %s908_s18, 4   ;;  %s1401_s12 = smov %s849_s13 }
 0x18e   : > { %s1402_s13 = smov %s853_s14  ;;  %s1403_s14 = smov %s920_s21 }
 0x18f   : > { %s1404_s15 = smov %s908_s18  ;;  %18 = sbr.rel (!%p16_p10) target bundleno = 5 (0x5), region = 77 }
 0x194   :  { %603 = vsyncpa [#allocation3], 1 }
 0x195   :  { %605 = vsyncpa [#allocation3 + $0x1], 1 }
 0x196   :  { %606 = vsyncpa [#allocation4], 1 }
 0x197   :  { %608 = vsyncpa [#allocation4 + $0x1], 1 }

</bundles_post_ra>
